<compile_context>
chip_gen: v7x
topology: tpu7x:2x2x1
jax: 0.10.0
libtpu: 0.0.40
codegen_flags: <defaults>
</compile_context>

<pallas_src>
import functools

import jax
import jax.numpy as jnp
from jax import lax
from jax.experimental import pallas as pl
from jax.experimental.pallas import tpu as pltpu


# ---------------- fused Pallas kernel ----------------

def _fused_kernel(xpad_ref, wtap_ref, cb_ref, lwp_ref, lb_ref, out_ref, *, H, W, N):
    # xpad_ref: (C_in, N*H*W + 2*PAD)  channel-major flattened batch, zero-padded ends
    # wtap_ref: (9, C_out, C_in)       per-tap conv weights, tap t = kh*3 + kw
    # cb_ref:   (C_out, 1)             conv bias
    # lwp_ref:  (C_out, HIDDEN, HW)    linear weight, lwp[c, d, p] = lin_w[d, c*HW + p]
    # lb_ref:   (1, HIDDEN)            linear bias
    # out_ref:  (N, HIDDEN)
    C_in = xpad_ref.shape[0]
    C_out, HIDDEN, HW = lwp_ref.shape
    L = N * HW
    PAD = (xpad_ref.shape[1] - L) // 2

    xpad = xpad_ref[...]                                   # single VMEM load (C_in, L+2*PAD)

    # Spatial coords of each flattened position q = n*HW + i*W + j (hoisted out of the
    # tap loop; powers-of-two path uses only shifts/ands).
    q = lax.broadcasted_iota(jnp.int32, (C_in, L), 1)
    if (W & (W - 1)) == 0 and (H & (H - 1)) == 0:
        j_idx = jnp.bitwise_and(q, W - 1)
        i_idx = jnp.bitwise_and(jnp.right_shift(q, W.bit_length() - 1), H - 1)
    else:
        j_idx = q % W
        i_idx = (q // W) % H

    # ---- 3x3 conv (padding=1) as 9 shifted, masked, accumulated MXU matmuls ----
    acc = jnp.zeros((C_out, L), jnp.float32)
    t = 0
    for dh in (-1, 0, 1):
        for dw in (-1, 0, 1):
            off = dh * W + dw
            start = PAD + off                              # static, in [0, 2*PAD]
            tap = xpad[:, start:start + L]                 # (C_in, L) static slice
            conds = []
            if dh == -1:
                conds.append(i_idx >= 1)
            if dh == 1:
                conds.append(i_idx <= H - 2)
            if dw == -1:
                conds.append(j_idx >= 1)
            if dw == 1:
                conds.append(j_idx <= W - 2)
            if conds:                                      # zero out wrapped rows/samples
                m = conds[0]
                for c in conds[1:]:
                    m = jnp.logical_and(m, c)
                tap = jnp.where(m, tap, 0.0)
            acc = acc + jnp.dot(wtap_ref[t], tap,
                                preferred_element_type=jnp.float32)
            t += 1

    act = jnp.maximum(acc + cb_ref[...], 0.0)              # fused bias + ReLU, (C_out, L)

    # ---- Linear over the PyTorch flatten order (channel-major, pixel-minor) ----
    # Per conv channel c: rows_c[n, p] = act[c, n*HW + p]; contract p against
    # lwp[c] (HIDDEN, HW) as A @ W^T (MXU handles the transposed operand).
    acts_by_sample = [act[:, n * HW:(n + 1) * HW] for n in range(N)]   # each (C_out, HW)
    out = jnp.zeros((N, HIDDEN), jnp.float32)
    dn = (((1,), (1,)), ((), ()))
    for c in range(C_out):
        rows_c = jnp.concatenate([a[c:c + 1, :] for a in acts_by_sample], axis=0)  # (N, HW)
        out = out + lax.dot_general(rows_c, lwp_ref[c], dn,
                                    preferred_element_type=jnp.float32)
    out_ref[...] = out + lb_ref[...]


# ---------------- one-time parameter packing (outside the forward pass) ----------------

def pack_params(conv_w, conv_b, lin_w, lin_b):
    """Convert PyTorch-layout weights into kernel-friendly layouts, done once."""
    C_out, C_in, KH, KW = conv_w.shape
    HIDDEN, K = lin_w.shape
    HW = K // C_out
    w_taps = jnp.transpose(conv_w, (2, 3, 0, 1)).reshape(KH * KW, C_out, C_in)
    lwp = jnp.transpose(lin_w.reshape(HIDDEN, C_out, HW), (1, 0, 2))   # (C_out, HIDDEN, HW)
    return {
        "w_taps": w_taps,                       # (9, C_out, C_in)
        "conv_b": conv_b.reshape(C_out, 1),     # (C_out, 1)
        "lin_w_p": lwp,                         # (C_out, HIDDEN, HW), lane-dense
        "lin_b": lin_b.reshape(1, HIDDEN),      # (1, HIDDEN)
    }


# ---------------- forward ----------------

@jax.jit
def inner_block_forward(x, packed):
    """Mirrors InnerBlock.forward for [Conv2d(C_in, C_out, 3, padding=1), ReLU(),
    Linear(C_out*H*W, HIDDEN)] with the pyreshape() flatten before the Linear."""
    N, C_in, H, W = x.shape
    T, C_out, _ = packed["w_taps"].shape
    _, HIDDEN, HW = packed["lin_w_p"].shape
    L = N * H * W
    PAD = W + 1                                  # covers the largest tap offset |dh*W+dw|

    # Channel-major flattened batch-spatial axis (q = n*H*W + i*W + j), zero-padded at
    # both ends so every 3x3 tap inside the kernel is a static in-bounds slice.
    x_cf = jnp.transpose(x, (1, 0, 2, 3)).reshape(C_in, L)
    x_cf = jnp.pad(x_cf, ((0, 0), (PAD, PAD)))   # (C_in, L + 2*PAD), ~9 KB

    kernel = functools.partial(_fused_kernel, H=H, W=W, N=N)

    return pl.pallas_call(
        kernel,
        out_shape=jax.ShapeDtypeStruct((N, HIDDEN), jnp.float32),
        grid_spec=pltpu.PrefetchScalarGridSpec(
            num_scalar_prefetch=0,
            grid=(1,),                           # one step: whole problem fits VMEM (<1 MiB)
            in_specs=[
                pl.BlockSpec((C_in, L + 2 * PAD), lambda i: (0, 0)),
                pl.BlockSpec((T, C_out, C_in), lambda i: (0, 0, 0)),
                pl.BlockSpec((C_out, 1), lambda i: (0, 0)),
                pl.BlockSpec((C_out, HIDDEN, HW), lambda i: (0, 0, 0)),
                pl.BlockSpec((1, HIDDEN), lambda i: (0, 0)),
            ],
            out_specs=pl.BlockSpec((N, HIDDEN), lambda i: (0, 0)),
        ),
        compiler_params=pltpu.CompilerParams(
            dimension_semantics=("arbitrary",)),
    )(x_cf, packed["w_taps"], packed["conv_b"], packed["lin_w_p"], packed["lin_b"])


# ---------------- pure-JAX reference for verification ----------------

def reference_forward(x, params):
    out = jax.lax.conv_general_dilated(
        x, params["conv_w"], window_strides=(1, 1), padding=((1, 1), (1, 1)),
        dimension_numbers=("NCHW", "OIHW", "NCHW"))
    out = out + params["conv_b"][None, :, None, None]
    out = jnp.maximum(out, 0.0)
    flat = out.reshape(out.shape[0], -1)
    return flat @ params["lin_w"].T + params["lin_b"][None, :]


# ---------------- main ----------------

if __name__ == "__main__":
    N, C_in, H, W = 2, 4, 16, 16
    C_out, HIDDEN = 8, 32
    K = C_out * H * W

    key = jax.random.PRNGKey(0)
    k_x, k_cw, k_cb, k_lw, k_lb = jax.random.split(key, 5)

    x = jax.random.normal(k_x, (N, C_in, H, W), dtype=jnp.float32)

    # Deterministic synthetic parameters (shapes from the module's layers).
    params = {
        "conv_w": 0.1 * jax.random.normal(k_cw, (C_out, C_in, 3, 3), jnp.float32),
        "conv_b": 0.1 * jax.random.normal(k_cb, (C_out,), jnp.float32),
        "lin_w": 0.02 * jax.random.normal(k_lw, (HIDDEN, K), jnp.float32),
        "lin_b": 0.02 * jax.random.normal(k_lb, (HIDDEN,), jnp.float32),
    }

    # One-time weight layout prep (outside the jitted forward).
    packed = jax.tree_util.tree_map(jax.block_until_ready,
                                    pack_params(params["conv_w"], params["conv_b"],
                                                params["lin_w"], params["lin_b"]))

    out = jax.block_until_ready(inner_block_forward(x, packed))
    ref = jax.block_until_ready(reference_forward(x, params))

    assert out.shape == (N, HIDDEN), out.shape
    assert jnp.allclose(out, ref, atol=1e-4, rtol=1e-4), \
        float(jnp.max(jnp.abs(out - ref)))

    print("KERNEL_OK")
</pallas_src>

<mosaic_0001>
module attributes {stable_mosaic.version = 11 : i64} {
  func.func @_fused_kernel(%arg0: i32, %arg1: memref<4x546xf32, #tpu.memory_space<vmem>>, %arg2: memref<9x8x4xf32, #tpu.memory_space<vmem>>, %arg3: memref<8x1xf32, #tpu.memory_space<vmem>>, %arg4: memref<8x32x256xf32, #tpu.memory_space<vmem>>, %arg5: memref<1x32xf32, #tpu.memory_space<vmem>>, %arg6: memref<2x32xf32, #tpu.memory_space<vmem>>) attributes {dimension_semantics = [#tpu.dimension_semantics<arbitrary>], iteration_bounds = array<i64: 1>, scalar_prefetch = 0 : i64, scratch_operands = 0 : i64, tpu.core_type = #tpu.core_type<tc>, window_params = [{pipeline_mode = #tpu.pipeline_mode<synchronous>, transform_indices = @transform_0, window_bounds = array<i64: 4, 546>}, {pipeline_mode = #tpu.pipeline_mode<synchronous>, transform_indices = @transform_1, window_bounds = array<i64: 9, 8, 4>}, {pipeline_mode = #tpu.pipeline_mode<synchronous>, transform_indices = @transform_2, window_bounds = array<i64: 8, 1>}, {pipeline_mode = #tpu.pipeline_mode<synchronous>, transform_indices = @transform_3, window_bounds = array<i64: 8, 32, 256>}, {pipeline_mode = #tpu.pipeline_mode<synchronous>, transform_indices = @transform_4, window_bounds = array<i64: 1, 32>}, {pipeline_mode = #tpu.pipeline_mode<synchronous>, transform_indices = @transform_5, window_bounds = array<i64: 2, 32>}]} {
    %c0 = arith.constant 0 : index
    %c0_0 = arith.constant 0 : index
    %0 = vector.load %arg1[%c0, %c0_0] : memref<4x546xf32, #tpu.memory_space<vmem>>, vector<4x546xf32>
    %1 = tpu.iota {dimensions = array<i32: 1>} : vector<4x512xi32>
    %c15_i32 = arith.constant 15 : i32
    %2 = vector.broadcast %c15_i32 : i32 to vector<4x512xi32>
    %3 = arith.andi %1, %2 : vector<4x512xi32>
    %c4_i32 = arith.constant 4 : i32
    %4 = vector.broadcast %c4_i32 : i32 to vector<4x512xi32>
    %5 = arith.shrsi %1, %4 : vector<4x512xi32>
    %c15_i32_1 = arith.constant 15 : i32
    %6 = vector.broadcast %c15_i32_1 : i32 to vector<4x512xi32>
    %7 = arith.andi %5, %6 : vector<4x512xi32>
    %cst = arith.constant 0.000000e+00 : f32
    %8 = vector.broadcast %cst : f32 to vector<8x512xf32>
    %9 = vector.extract_strided_slice %0 {offsets = [0, 0], sizes = [4, 512], strides = [1, 1]} : vector<4x546xf32> to vector<4x512xf32>
    %c1_i32 = arith.constant 1 : i32
    %10 = vector.broadcast %c1_i32 : i32 to vector<4x512xi32>
    %11 = arith.cmpi sge, %7, %10 : vector<4x512xi32>
    %c1_i32_2 = arith.constant 1 : i32
    %12 = vector.broadcast %c1_i32_2 : i32 to vector<4x512xi32>
    %13 = arith.cmpi sge, %3, %12 : vector<4x512xi32>
    %14 = arith.andi %11, %13 : vector<4x512xi1>
    %cst_3 = arith.constant 0.000000e+00 : f32
    %15 = vector.broadcast %cst_3 : f32 to vector<4x512xf32>
    %16 = arith.select %14, %9, %15 : vector<4x512xi1>, vector<4x512xf32>
    %c0_4 = arith.constant 0 : index
    %c0_5 = arith.constant 0 : index
    %c0_6 = arith.constant 0 : index
    %17 = vector.load %arg2[%c0_4, %c0_5, %c0_6] : memref<9x8x4xf32, #tpu.memory_space<vmem>>, vector<1x8x4xf32>
    %18 = vector.shape_cast %17 : vector<1x8x4xf32> to vector<8x4xf32>
    %cst_7 = arith.constant dense<0.000000e+00> : vector<8x512xf32>
    %19 = tpu.matmul %18, %16, %cst_7 {dimension_numbers = #tpu.dot_dimension_numbers<[1], [0], [0], [1], [0, 0, 1, 1], [], []>} : vector<8x4xf32>, vector<4x512xf32>, vector<8x512xf32> -> vector<8x512xf32>
    %20 = arith.addf %8, %19 : vector<8x512xf32>
    %21 = vector.extract_strided_slice %0 {offsets = [0, 1], sizes = [4, 512], strides = [1, 1]} : vector<4x546xf32> to vector<4x512xf32>
    %c1_i32_8 = arith.constant 1 : i32
    %22 = vector.broadcast %c1_i32_8 : i32 to vector<4x512xi32>
    %23 = arith.cmpi sge, %7, %22 : vector<4x512xi32>
    %cst_9 = arith.constant 0.000000e+00 : f32
    %24 = vector.broadcast %cst_9 : f32 to vector<4x512xf32>
    %25 = arith.select %23, %21, %24 : vector<4x512xi1>, vector<4x512xf32>
    %c1 = arith.constant 1 : index
    %c0_10 = arith.constant 0 : index
    %c0_11 = arith.constant 0 : index
    %26 = vector.load %arg2[%c1, %c0_10, %c0_11] : memref<9x8x4xf32, #tpu.memory_space<vmem>>, vector<1x8x4xf32>
    %27 = vector.shape_cast %26 : vector<1x8x4xf32> to vector<8x4xf32>
    %cst_12 = arith.constant dense<0.000000e+00> : vector<8x512xf32>
    %28 = tpu.matmul %27, %25, %cst_12 {dimension_numbers = #tpu.dot_dimension_numbers<[1], [0], [0], [1], [0, 0, 1, 1], [], []>} : vector<8x4xf32>, vector<4x512xf32>, vector<8x512xf32> -> vector<8x512xf32>
    %29 = arith.addf %20, %28 : vector<8x512xf32>
    %30 = vector.extract_strided_slice %0 {offsets = [0, 2], sizes = [4, 512], strides = [1, 1]} : vector<4x546xf32> to vector<4x512xf32>
    %c1_i32_13 = arith.constant 1 : i32
    %31 = vector.broadcast %c1_i32_13 : i32 to vector<4x512xi32>
    %32 = arith.cmpi sge, %7, %31 : vector<4x512xi32>
    %c14_i32 = arith.constant 14 : i32
    %33 = vector.broadcast %c14_i32 : i32 to vector<4x512xi32>
    %34 = arith.cmpi sle, %3, %33 : vector<4x512xi32>
    %35 = arith.andi %32, %34 : vector<4x512xi1>
    %cst_14 = arith.constant 0.000000e+00 : f32
    %36 = vector.broadcast %cst_14 : f32 to vector<4x512xf32>
    %37 = arith.select %35, %30, %36 : vector<4x512xi1>, vector<4x512xf32>
    %c2 = arith.constant 2 : index
    %c0_15 = arith.constant 0 : index
    %c0_16 = arith.constant 0 : index
    %38 = vector.load %arg2[%c2, %c0_15, %c0_16] : memref<9x8x4xf32, #tpu.memory_space<vmem>>, vector<1x8x4xf32>
    %39 = vector.shape_cast %38 : vector<1x8x4xf32> to vector<8x4xf32>
    %cst_17 = arith.constant dense<0.000000e+00> : vector<8x512xf32>
    %40 = tpu.matmul %39, %37, %cst_17 {dimension_numbers = #tpu.dot_dimension_numbers<[1], [0], [0], [1], [0, 0, 1, 1], [], []>} : vector<8x4xf32>, vector<4x512xf32>, vector<8x512xf32> -> vector<8x512xf32>
    %41 = arith.addf %29, %40 : vector<8x512xf32>
    %42 = vector.extract_strided_slice %0 {offsets = [0, 16], sizes = [4, 512], strides = [1, 1]} : vector<4x546xf32> to vector<4x512xf32>
    %c1_i32_18 = arith.constant 1 : i32
    %43 = vector.broadcast %c1_i32_18 : i32 to vector<4x512xi32>
    %44 = arith.cmpi sge, %3, %43 : vector<4x512xi32>
    %cst_19 = arith.constant 0.000000e+00 : f32
    %45 = vector.broadcast %cst_19 : f32 to vector<4x512xf32>
    %46 = arith.select %44, %42, %45 : vector<4x512xi1>, vector<4x512xf32>
    %c3 = arith.constant 3 : index
    %c0_20 = arith.constant 0 : index
    %c0_21 = arith.constant 0 : index
    %47 = vector.load %arg2[%c3, %c0_20, %c0_21] : memref<9x8x4xf32, #tpu.memory_space<vmem>>, vector<1x8x4xf32>
    %48 = vector.shape_cast %47 : vector<1x8x4xf32> to vector<8x4xf32>
    %cst_22 = arith.constant dense<0.000000e+00> : vector<8x512xf32>
    %49 = tpu.matmul %48, %46, %cst_22 {dimension_numbers = #tpu.dot_dimension_numbers<[1], [0], [0], [1], [0, 0, 1, 1], [], []>} : vector<8x4xf32>, vector<4x512xf32>, vector<8x512xf32> -> vector<8x512xf32>
    %50 = arith.addf %41, %49 : vector<8x512xf32>
    %51 = vector.extract_strided_slice %0 {offsets = [0, 17], sizes = [4, 512], strides = [1, 1]} : vector<4x546xf32> to vector<4x512xf32>
    %c4 = arith.constant 4 : index
    %c0_23 = arith.constant 0 : index
    %c0_24 = arith.constant 0 : index
    %52 = vector.load %arg2[%c4, %c0_23, %c0_24] : memref<9x8x4xf32, #tpu.memory_space<vmem>>, vector<1x8x4xf32>
    %53 = vector.shape_cast %52 : vector<1x8x4xf32> to vector<8x4xf32>
    %cst_25 = arith.constant dense<0.000000e+00> : vector<8x512xf32>
    %54 = tpu.matmul %53, %51, %cst_25 {dimension_numbers = #tpu.dot_dimension_numbers<[1], [0], [0], [1], [0, 0, 1, 1], [], []>} : vector<8x4xf32>, vector<4x512xf32>, vector<8x512xf32> -> vector<8x512xf32>
    %55 = arith.addf %50, %54 : vector<8x512xf32>
    %56 = vector.extract_strided_slice %0 {offsets = [0, 18], sizes = [4, 512], strides = [1, 1]} : vector<4x546xf32> to vector<4x512xf32>
    %c14_i32_26 = arith.constant 14 : i32
    %57 = vector.broadcast %c14_i32_26 : i32 to vector<4x512xi32>
    %58 = arith.cmpi sle, %3, %57 : vector<4x512xi32>
    %cst_27 = arith.constant 0.000000e+00 : f32
    %59 = vector.broadcast %cst_27 : f32 to vector<4x512xf32>
    %60 = arith.select %58, %56, %59 : vector<4x512xi1>, vector<4x512xf32>
    %c5 = arith.constant 5 : index
    %c0_28 = arith.constant 0 : index
    %c0_29 = arith.constant 0 : index
    %61 = vector.load %arg2[%c5, %c0_28, %c0_29] : memref<9x8x4xf32, #tpu.memory_space<vmem>>, vector<1x8x4xf32>
    %62 = vector.shape_cast %61 : vector<1x8x4xf32> to vector<8x4xf32>
    %cst_30 = arith.constant dense<0.000000e+00> : vector<8x512xf32>
    %63 = tpu.matmul %62, %60, %cst_30 {dimension_numbers = #tpu.dot_dimension_numbers<[1], [0], [0], [1], [0, 0, 1, 1], [], []>} : vector<8x4xf32>, vector<4x512xf32>, vector<8x512xf32> -> vector<8x512xf32>
    %64 = arith.addf %55, %63 : vector<8x512xf32>
    %65 = vector.extract_strided_slice %0 {offsets = [0, 32], sizes = [4, 512], strides = [1, 1]} : vector<4x546xf32> to vector<4x512xf32>
    %c14_i32_31 = arith.constant 14 : i32
    %66 = vector.broadcast %c14_i32_31 : i32 to vector<4x512xi32>
    %67 = arith.cmpi sle, %7, %66 : vector<4x512xi32>
    %c1_i32_32 = arith.constant 1 : i32
    %68 = vector.broadcast %c1_i32_32 : i32 to vector<4x512xi32>
    %69 = arith.cmpi sge, %3, %68 : vector<4x512xi32>
    %70 = arith.andi %67, %69 : vector<4x512xi1>
    %cst_33 = arith.constant 0.000000e+00 : f32
    %71 = vector.broadcast %cst_33 : f32 to vector<4x512xf32>
    %72 = arith.select %70, %65, %71 : vector<4x512xi1>, vector<4x512xf32>
    %c6 = arith.constant 6 : index
    %c0_34 = arith.constant 0 : index
    %c0_35 = arith.constant 0 : index
    %73 = vector.load %arg2[%c6, %c0_34, %c0_35] : memref<9x8x4xf32, #tpu.memory_space<vmem>>, vector<1x8x4xf32>
    %74 = vector.shape_cast %73 : vector<1x8x4xf32> to vector<8x4xf32>
    %cst_36 = arith.constant dense<0.000000e+00> : vector<8x512xf32>
    %75 = tpu.matmul %74, %72, %cst_36 {dimension_numbers = #tpu.dot_dimension_numbers<[1], [0], [0], [1], [0, 0, 1, 1], [], []>} : vector<8x4xf32>, vector<4x512xf32>, vector<8x512xf32> -> vector<8x512xf32>
    %76 = arith.addf %64, %75 : vector<8x512xf32>
    %77 = vector.extract_strided_slice %0 {offsets = [0, 33], sizes = [4, 512], strides = [1, 1]} : vector<4x546xf32> to vector<4x512xf32>
    %c14_i32_37 = arith.constant 14 : i32
    %78 = vector.broadcast %c14_i32_37 : i32 to vector<4x512xi32>
    %79 = arith.cmpi sle, %7, %78 : vector<4x512xi32>
    %cst_38 = arith.constant 0.000000e+00 : f32
    %80 = vector.broadcast %cst_38 : f32 to vector<4x512xf32>
    %81 = arith.select %79, %77, %80 : vector<4x512xi1>, vector<4x512xf32>
    %c7 = arith.constant 7 : index
    %c0_39 = arith.constant 0 : index
    %c0_40 = arith.constant 0 : index
    %82 = vector.load %arg2[%c7, %c0_39, %c0_40] : memref<9x8x4xf32, #tpu.memory_space<vmem>>, vector<1x8x4xf32>
    %83 = vector.shape_cast %82 : vector<1x8x4xf32> to vector<8x4xf32>
    %cst_41 = arith.constant dense<0.000000e+00> : vector<8x512xf32>
    %84 = tpu.matmul %83, %81, %cst_41 {dimension_numbers = #tpu.dot_dimension_numbers<[1], [0], [0], [1], [0, 0, 1, 1], [], []>} : vector<8x4xf32>, vector<4x512xf32>, vector<8x512xf32> -> vector<8x512xf32>
    %85 = arith.addf %76, %84 : vector<8x512xf32>
    %86 = vector.extract_strided_slice %0 {offsets = [0, 34], sizes = [4, 512], strides = [1, 1]} : vector<4x546xf32> to vector<4x512xf32>
    %c14_i32_42 = arith.constant 14 : i32
    %87 = vector.broadcast %c14_i32_42 : i32 to vector<4x512xi32>
    %88 = arith.cmpi sle, %7, %87 : vector<4x512xi32>
    %c14_i32_43 = arith.constant 14 : i32
    %89 = vector.broadcast %c14_i32_43 : i32 to vector<4x512xi32>
    %90 = arith.cmpi sle, %3, %89 : vector<4x512xi32>
    %91 = arith.andi %88, %90 : vector<4x512xi1>
    %cst_44 = arith.constant 0.000000e+00 : f32
    %92 = vector.broadcast %cst_44 : f32 to vector<4x512xf32>
    %93 = arith.select %91, %86, %92 : vector<4x512xi1>, vector<4x512xf32>
    %c8 = arith.constant 8 : index
    %c0_45 = arith.constant 0 : index
    %c0_46 = arith.constant 0 : index
    %94 = vector.load %arg2[%c8, %c0_45, %c0_46] : memref<9x8x4xf32, #tpu.memory_space<vmem>>, vector<1x8x4xf32>
    %95 = vector.shape_cast %94 : vector<1x8x4xf32> to vector<8x4xf32>
    %cst_47 = arith.constant dense<0.000000e+00> : vector<8x512xf32>
    %96 = tpu.matmul %95, %93, %cst_47 {dimension_numbers = #tpu.dot_dimension_numbers<[1], [0], [0], [1], [0, 0, 1, 1], [], []>} : vector<8x4xf32>, vector<4x512xf32>, vector<8x512xf32> -> vector<8x512xf32>
    %97 = arith.addf %85, %96 : vector<8x512xf32>
    %c0_48 = arith.constant 0 : index
    %c0_49 = arith.constant 0 : index
    %98 = vector.load %arg3[%c0_48, %c0_49] : memref<8x1xf32, #tpu.memory_space<vmem>>, vector<8x1xf32>
    %99 = vector.broadcast %98 : vector<8x1xf32> to vector<8x512xf32>
    %100 = arith.addf %97, %99 : vector<8x512xf32>
    %cst_50 = arith.constant 0.000000e+00 : f32
    %101 = vector.broadcast %cst_50 : f32 to vector<8x512xf32>
    %102 = arith.maximumf %100, %101 : vector<8x512xf32>
    %103 = vector.extract_strided_slice %102 {offsets = [0, 0], sizes = [8, 256], strides = [1, 1]} : vector<8x512xf32> to vector<8x256xf32>
    %104 = vector.extract_strided_slice %102 {offsets = [0, 256], sizes = [8, 256], strides = [1, 1]} : vector<8x512xf32> to vector<8x256xf32>
    %cst_51 = arith.constant 0.000000e+00 : f32
    %105 = vector.broadcast %cst_51 : f32 to vector<2x32xf32>
    %106 = vector.extract_strided_slice %103 {offsets = [0, 0], sizes = [1, 256], strides = [1, 1]} : vector<8x256xf32> to vector<1x256xf32>
    %107 = vector.extract_strided_slice %104 {offsets = [0, 0], sizes = [1, 256], strides = [1, 1]} : vector<8x256xf32> to vector<1x256xf32>
    %108 = tpu.concatenate %106, %107 in 0 : vector<1x256xf32>, vector<1x256xf32> -> vector<2x256xf32>
    %c0_52 = arith.constant 0 : index
    %c0_53 = arith.constant 0 : index
    %c0_54 = arith.constant 0 : index
    %109 = vector.load %arg4[%c0_52, %c0_53, %c0_54] : memref<8x32x256xf32, #tpu.memory_space<vmem>>, vector<1x32x256xf32>
    %110 = vector.shape_cast %109 : vector<1x32x256xf32> to vector<32x256xf32>
    %cst_55 = arith.constant dense<0.000000e+00> : vector<2x32xf32>
    %111 = tpu.matmul %108, %110, %cst_55 {dimension_numbers = #tpu.dot_dimension_numbers<[1], [1], [0], [0], [0, 0, 1, 0], [], []>} : vector<2x256xf32>, vector<32x256xf32>, vector<2x32xf32> -> vector<2x32xf32>
    %112 = arith.addf %105, %111 : vector<2x32xf32>
    %113 = vector.extract_strided_slice %103 {offsets = [1, 0], sizes = [1, 256], strides = [1, 1]} : vector<8x256xf32> to vector<1x256xf32>
    %114 = vector.extract_strided_slice %104 {offsets = [1, 0], sizes = [1, 256], strides = [1, 1]} : vector<8x256xf32> to vector<1x256xf32>
    %115 = tpu.concatenate %113, %114 in 0 : vector<1x256xf32>, vector<1x256xf32> -> vector<2x256xf32>
    %c1_56 = arith.constant 1 : index
    %c0_57 = arith.constant 0 : index
    %c0_58 = arith.constant 0 : index
    %116 = vector.load %arg4[%c1_56, %c0_57, %c0_58] : memref<8x32x256xf32, #tpu.memory_space<vmem>>, vector<1x32x256xf32>
    %117 = vector.shape_cast %116 : vector<1x32x256xf32> to vector<32x256xf32>
    %cst_59 = arith.constant dense<0.000000e+00> : vector<2x32xf32>
    %118 = tpu.matmul %115, %117, %cst_59 {dimension_numbers = #tpu.dot_dimension_numbers<[1], [1], [0], [0], [0, 0, 1, 0], [], []>} : vector<2x256xf32>, vector<32x256xf32>, vector<2x32xf32> -> vector<2x32xf32>
    %119 = arith.addf %112, %118 : vector<2x32xf32>
    %120 = vector.extract_strided_slice %103 {offsets = [2, 0], sizes = [1, 256], strides = [1, 1]} : vector<8x256xf32> to vector<1x256xf32>
    %121 = vector.extract_strided_slice %104 {offsets = [2, 0], sizes = [1, 256], strides = [1, 1]} : vector<8x256xf32> to vector<1x256xf32>
    %122 = tpu.concatenate %120, %121 in 0 : vector<1x256xf32>, vector<1x256xf32> -> vector<2x256xf32>
    %c2_60 = arith.constant 2 : index
    %c0_61 = arith.constant 0 : index
    %c0_62 = arith.constant 0 : index
    %123 = vector.load %arg4[%c2_60, %c0_61, %c0_62] : memref<8x32x256xf32, #tpu.memory_space<vmem>>, vector<1x32x256xf32>
    %124 = vector.shape_cast %123 : vector<1x32x256xf32> to vector<32x256xf32>
    %cst_63 = arith.constant dense<0.000000e+00> : vector<2x32xf32>
    %125 = tpu.matmul %122, %124, %cst_63 {dimension_numbers = #tpu.dot_dimension_numbers<[1], [1], [0], [0], [0, 0, 1, 0], [], []>} : vector<2x256xf32>, vector<32x256xf32>, vector<2x32xf32> -> vector<2x32xf32>
    %126 = arith.addf %119, %125 : vector<2x32xf32>
    %127 = vector.extract_strided_slice %103 {offsets = [3, 0], sizes = [1, 256], strides = [1, 1]} : vector<8x256xf32> to vector<1x256xf32>
    %128 = vector.extract_strided_slice %104 {offsets = [3, 0], sizes = [1, 256], strides = [1, 1]} : vector<8x256xf32> to vector<1x256xf32>
    %129 = tpu.concatenate %127, %128 in 0 : vector<1x256xf32>, vector<1x256xf32> -> vector<2x256xf32>
    %c3_64 = arith.constant 3 : index
    %c0_65 = arith.constant 0 : index
    %c0_66 = arith.constant 0 : index
    %130 = vector.load %arg4[%c3_64, %c0_65, %c0_66] : memref<8x32x256xf32, #tpu.memory_space<vmem>>, vector<1x32x256xf32>
    %131 = vector.shape_cast %130 : vector<1x32x256xf32> to vector<32x256xf32>
    %cst_67 = arith.constant dense<0.000000e+00> : vector<2x32xf32>
    %132 = tpu.matmul %129, %131, %cst_67 {dimension_numbers = #tpu.dot_dimension_numbers<[1], [1], [0], [0], [0, 0, 1, 0], [], []>} : vector<2x256xf32>, vector<32x256xf32>, vector<2x32xf32> -> vector<2x32xf32>
    %133 = arith.addf %126, %132 : vector<2x32xf32>
    %134 = vector.extract_strided_slice %103 {offsets = [4, 0], sizes = [1, 256], strides = [1, 1]} : vector<8x256xf32> to vector<1x256xf32>
    %135 = vector.extract_strided_slice %104 {offsets = [4, 0], sizes = [1, 256], strides = [1, 1]} : vector<8x256xf32> to vector<1x256xf32>
    %136 = tpu.concatenate %134, %135 in 0 : vector<1x256xf32>, vector<1x256xf32> -> vector<2x256xf32>
    %c4_68 = arith.constant 4 : index
    %c0_69 = arith.constant 0 : index
    %c0_70 = arith.constant 0 : index
    %137 = vector.load %arg4[%c4_68, %c0_69, %c0_70] : memref<8x32x256xf32, #tpu.memory_space<vmem>>, vector<1x32x256xf32>
    %138 = vector.shape_cast %137 : vector<1x32x256xf32> to vector<32x256xf32>
    %cst_71 = arith.constant dense<0.000000e+00> : vector<2x32xf32>
    %139 = tpu.matmul %136, %138, %cst_71 {dimension_numbers = #tpu.dot_dimension_numbers<[1], [1], [0], [0], [0, 0, 1, 0], [], []>} : vector<2x256xf32>, vector<32x256xf32>, vector<2x32xf32> -> vector<2x32xf32>
    %140 = arith.addf %133, %139 : vector<2x32xf32>
    %141 = vector.extract_strided_slice %103 {offsets = [5, 0], sizes = [1, 256], strides = [1, 1]} : vector<8x256xf32> to vector<1x256xf32>
    %142 = vector.extract_strided_slice %104 {offsets = [5, 0], sizes = [1, 256], strides = [1, 1]} : vector<8x256xf32> to vector<1x256xf32>
    %143 = tpu.concatenate %141, %142 in 0 : vector<1x256xf32>, vector<1x256xf32> -> vector<2x256xf32>
    %c5_72 = arith.constant 5 : index
    %c0_73 = arith.constant 0 : index
    %c0_74 = arith.constant 0 : index
    %144 = vector.load %arg4[%c5_72, %c0_73, %c0_74] : memref<8x32x256xf32, #tpu.memory_space<vmem>>, vector<1x32x256xf32>
    %145 = vector.shape_cast %144 : vector<1x32x256xf32> to vector<32x256xf32>
    %cst_75 = arith.constant dense<0.000000e+00> : vector<2x32xf32>
    %146 = tpu.matmul %143, %145, %cst_75 {dimension_numbers = #tpu.dot_dimension_numbers<[1], [1], [0], [0], [0, 0, 1, 0], [], []>} : vector<2x256xf32>, vector<32x256xf32>, vector<2x32xf32> -> vector<2x32xf32>
    %147 = arith.addf %140, %146 : vector<2x32xf32>
    %148 = vector.extract_strided_slice %103 {offsets = [6, 0], sizes = [1, 256], strides = [1, 1]} : vector<8x256xf32> to vector<1x256xf32>
    %149 = vector.extract_strided_slice %104 {offsets = [6, 0], sizes = [1, 256], strides = [1, 1]} : vector<8x256xf32> to vector<1x256xf32>
    %150 = tpu.concatenate %148, %149 in 0 : vector<1x256xf32>, vector<1x256xf32> -> vector<2x256xf32>
    %c6_76 = arith.constant 6 : index
    %c0_77 = arith.constant 0 : index
    %c0_78 = arith.constant 0 : index
    %151 = vector.load %arg4[%c6_76, %c0_77, %c0_78] : memref<8x32x256xf32, #tpu.memory_space<vmem>>, vector<1x32x256xf32>
    %152 = vector.shape_cast %151 : vector<1x32x256xf32> to vector<32x256xf32>
    %cst_79 = arith.constant dense<0.000000e+00> : vector<2x32xf32>
    %153 = tpu.matmul %150, %152, %cst_79 {dimension_numbers = #tpu.dot_dimension_numbers<[1], [1], [0], [0], [0, 0, 1, 0], [], []>} : vector<2x256xf32>, vector<32x256xf32>, vector<2x32xf32> -> vector<2x32xf32>
    %154 = arith.addf %147, %153 : vector<2x32xf32>
    %155 = vector.extract_strided_slice %103 {offsets = [7, 0], sizes = [1, 256], strides = [1, 1]} : vector<8x256xf32> to vector<1x256xf32>
    %156 = vector.extract_strided_slice %104 {offsets = [7, 0], sizes = [1, 256], strides = [1, 1]} : vector<8x256xf32> to vector<1x256xf32>
    %157 = tpu.concatenate %155, %156 in 0 : vector<1x256xf32>, vector<1x256xf32> -> vector<2x256xf32>
    %c7_80 = arith.constant 7 : index
    %c0_81 = arith.constant 0 : index
    %c0_82 = arith.constant 0 : index
    %158 = vector.load %arg4[%c7_80, %c0_81, %c0_82] : memref<8x32x256xf32, #tpu.memory_space<vmem>>, vector<1x32x256xf32>
    %159 = vector.shape_cast %158 : vector<1x32x256xf32> to vector<32x256xf32>
    %cst_83 = arith.constant dense<0.000000e+00> : vector<2x32xf32>
    %160 = tpu.matmul %157, %159, %cst_83 {dimension_numbers = #tpu.dot_dimension_numbers<[1], [1], [0], [0], [0, 0, 1, 0], [], []>} : vector<2x256xf32>, vector<32x256xf32>, vector<2x32xf32> -> vector<2x32xf32>
    %161 = arith.addf %154, %160 : vector<2x32xf32>
    %c0_84 = arith.constant 0 : index
    %c0_85 = arith.constant 0 : index
    %162 = vector.load %arg5[%c0_84, %c0_85] : memref<1x32xf32, #tpu.memory_space<vmem>>, vector<1x32xf32>
    %163 = vector.broadcast %162 : vector<1x32xf32> to vector<2x32xf32>
    %164 = arith.addf %161, %163 : vector<2x32xf32>
    %c0_86 = arith.constant 0 : index
    %c0_87 = arith.constant 0 : index
    %165 = vector.load %arg6[%c0_86, %c0_87] : memref<2x32xf32, #tpu.memory_space<vmem>>, vector<2x32xf32>
    tpu.vector_store %arg6[%c0_86, %c0_87], %164 {strides = array<i32>} : memref<2x32xf32, #tpu.memory_space<vmem>>, vector<2x32xf32>,
    return
  }
  func.func @transform_0(%arg0: i32) -> (i32, i32) {
    %c0_i32 = arith.constant 0 : i32
    %c0_i32_0 = arith.constant 0 : i32
    %c0_i32_1 = arith.constant 0 : i32
    return %c0_i32, %c0_i32_0 : i32, i32
  }
  func.func @transform_1(%arg0: i32) -> (i32, i32, i32) {
    %c0_i32 = arith.constant 0 : i32
    %c0_i32_0 = arith.constant 0 : i32
    %c0_i32_1 = arith.constant 0 : i32
    %c0_i32_2 = arith.constant 0 : i32
    return %c0_i32, %c0_i32_0, %c0_i32_1 : i32, i32, i32
  }
  func.func @transform_2(%arg0: i32) -> (i32, i32) {
    %c0_i32 = arith.constant 0 : i32
    %c0_i32_0 = arith.constant 0 : i32
    %c0_i32_1 = arith.constant 0 : i32
    return %c0_i32, %c0_i32_0 : i32, i32
  }
  func.func @transform_3(%arg0: i32) -> (i32, i32, i32) {
    %c0_i32 = arith.constant 0 : i32
    %c0_i32_0 = arith.constant 0 : i32
    %c0_i32_1 = arith.constant 0 : i32
    %c0_i32_2 = arith.constant 0 : i32
    return %c0_i32, %c0_i32_0, %c0_i32_1 : i32, i32, i32
  }
  func.func @transform_4(%arg0: i32) -> (i32, i32) {
    %c0_i32 = arith.constant 0 : i32
    %c0_i32_0 = arith.constant 0 : i32
    %c0_i32_1 = arith.constant 0 : i32
    return %c0_i32, %c0_i32_0 : i32, i32
  }
  func.func @transform_5(%arg0: i32) -> (i32, i32) {
    %c0_i32 = arith.constant 0 : i32
    %c0_i32_0 = arith.constant 0 : i32
    %c0_i32_1 = arith.constant 0 : i32
    return %c0_i32, %c0_i32_0 : i32, i32
  }
}

</mosaic_0001>

<bundles_post_ra>
// kernel: inner_block_forward.1
= control target key start
LH: loop header
LB: loop body
LE: loop exit
PB: predicated region body
PF: predicated region fallthrough
CT: control target
= control target key end

     0   :  { %s2721_s22 = smov 127   ;;  %v2722_v4 = vmov 0.0   ;;  %s3448_s0 = inlined_call_operand.vmem [shape: f32[4,546], index: 0, kind: input, shape index: {}]   ;;  %s3449_s1 = inlined_call_operand.vmem [shape: f32[9,8,4], index: 1, kind: input, shape index: {}]   ;;  %s3450_s2 = inlined_call_operand.vmem [shape: f32[8,1], index: 2, kind: input, shape index: {}]   ;;  %s3451_s3 = inlined_call_operand.vmem [shape: f32[8,32,256], index: 3, kind: input, shape index: {}]   ;;  %s3452_s4 = inlined_call_operand.vmem [shape: f32[1,32], index: 4, kind: input, shape index: {}]   ;;  %s3453_s5 = inlined_call_operand.hbm [shape: f32[2,32], index: 5, kind: output, shape index: {}]  }
   0x1   :  { %v2765_v0 = vld [vmem:[%s3448_s0] sm:$0xff]  ;;  %v2770_v1 = vld [vmem:[%s3448_s0 + $0x8] sm:$0xff]  ;;  %171 = vmatprep.mubr.f32.mxu0 %v2722_v4 }
   0x2   :  { %65 = vrot.lane.b32.xlu1 %v2765_v0, %s2721_s22  ;;  %v2775_v2 = vcombine.high %v2765_v0, %v2765_v0  ;;  %v2779_v3 = vcombine.high %v2770_v1, %v2770_v1 }
   0x4   :  { %67 = vrot.lane.b32.xlu0 %v2775_v2, %s2721_s22 }
   0x5   :  { %10 = vsyncpa [#allocation3], 0  ;;  %242 = vmatprep.mubr.f32.mxu1 %v2722_v4  ;;  %v23_v5 = vld [vmem:[%s3448_s0 + $0x10] sm:$0xf]  ;;  %s2723_s25 = smov 126   ;;  %s2724_s26 = smov 112   ;;  %v24_v8 = vlaneseq }
   0x6   :  { %71 = vrot.lane.b32.xlu1 %v2779_v3, %s2721_s22  ;;  %s2725_s0 = smov 111   ;;  %s2726_s27 = smov 110   ;;  %v2730_v6 = vmov 0   ;;  %v1716_v7 = vld [vmem:[%s3450_s2] sm:$0xff]  ;;  %vm75_vm1 = vcmask 1039360   ;;  %vm94_vm6 = vcmask 1043456  }
   0x7   :  { %s2727_s28 = smov 96   ;;  %s2728_s29 = smov 95   ;;  %2694 = vset.pattern.permute.xlu0 %v2730_v6  ;;  %v25_v9 = vand.u32 127, %v24_v8  ;;  %v2468_v39 = vld [vmem:[%s3449_s1 + $0x8] sm:$0xff]  ;;  %vm90_vm10 = vcmask 31744   ;;  %v63_v63 = vld [vmem:[%s3449_s1] sm:$0xff] }
   0x8   :  { %69 = vrot.lane.b32.xlu0 %v2770_v1, %s2721_s22  ;;  %s2729_s30 = smov 94   ;;  %s2731_s14 = smov [#allocation2]  }
   0x9   :  { %v26_v10 = vadd.s32 128, %v25_v9  ;;  %v28_v12 = vadd.s32 384, %v25_v9  ;;  %v33_v13 = vshra.s32 %v25_v9, 4  ;;  %v2820_v14 = vadd.s32 256, %v25_v9  ;;  %s2460_s15 = sshll.u32 %s2731_s14, 4  ;;  %s2461_s15 = int_to_ptr.vmem [resolvable:$true] %s2460_s15 }
   0xa   :  { %416 = vrot.lane.b32.xlu1 %v2775_v2, %s2723_s25  ;;  %v29_v16 = vand.u32 15, %v25_v9  ;;  %s2697_s16 = scalar_lea.vmem %s2461_s15, 32  ;;  %p2702_p1 = scmp.lt.s32.totalorder %s2461_s15, %s2461_s15 }
   0xb   :  { %v34_v11 = vshra.s32 %v26_v10, 4  ;;  %v30_v15 = vand.u32 15, %v26_v10  ;;  %v36_v19 = vshra.s32 %v28_v12, 4  ;;  %v2824_v20 = vand.u32 15, %v33_v13  ;;  %v2481_v13 = vld [vmem:[%s3449_s1 + $0x10] sm:$0xff]  ;;  %p2698_p0 = scmp.ne.s32.totalorder %s2461_s15, %s2697_s16  ;;  %p2703_p2 = scmp.lt.s32.totalorder %s2697_s16, %s2697_s16 }
   0xc   :  { %73 = vrot.lane.b32.xlu0 %v23_v5, %s2721_s22  ;;  %v35_v21 = vshra.s32 %v2820_v14, 4  ;;  %v32_v24 = vand.u32 15, %v28_v12  ;;  %vm2831_vm2 = vcmp.ge.s32.totalorder %v29_v16, 1  ;;  %v31_v26 = vand.u32 15, %v2820_v14 }
   0xd   :  { %v2822_v18 = vand.u32 15, %v34_v11  ;;  %vm2827_vm0 = vcmp.ge.s32.totalorder %v30_v15, 1  ;;  %v2837_v28 = vand.u32 15, %v36_v19  ;;  %vm41_vm4 = vcmp.ge.s32.totalorder %v2824_v20, 1  ;;  %p2704_p3 = por %p2703_p2, %p2702_p1 }
   0xe   :  { %414 = vrot.lane.b32.xlu1 %v2765_v0, %s2723_s25  ;;  %v2840_v29 = vand.u32 15, %v35_v21  ;;  %vm2855_vm7 = vmand %vm41_vm4, %vm2831_vm2  ;;  %vm2859_vm8 = vcmp.ge.s32.totalorder %v32_v24, 1  ;;  %vm2864_vm9 = vcmp.ge.s32.totalorder %v31_v26, 1  ;;  %vm2902_vm15 = vcmp.le.s32.totalorder %v30_v15, 14 }
   0xf   :  { %vm42_vm3 = vcmp.ge.s32.totalorder %v2822_v18, 1  ;;  %vm44_vm11 = vcmp.ge.s32.totalorder %v2837_v28, 1  ;;  %v59_v42 = vsel %vm2855_vm7, %v2765_v0, 0.0  ;;  %vm424_vm7 = vcmask 1031168   ;;  %p2705_p4 = pnand %p2704_p3, %p2698_p0 }
  0x10   :  { %418 = vrot.lane.b32.xlu0 %v2770_v1, %s2723_s25  ;;  %vm2846_vm5 = vmand %vm42_vm3, %vm2827_vm0  ;;  %vm43_vm12 = vcmp.ge.s32.totalorder %v2840_v29, 1 }
  0x11   :  { %v60_v40 = vsel %vm2846_vm5, %v2775_v2, 0.0  ;;  %vm2888_vm13 = vmand %vm44_vm11, %vm2859_vm8  ;;  %vm2916_vm5 = vcmp.le.s32.totalorder %v29_v16, 14 }
  0x12   :  { %422 = vrot.lane.b32.xlu1 %v23_v5, %s2723_s25  ;;  %vm2898_vm14 = vmand %vm43_vm12, %vm2864_vm9  ;;  %v62_v51 = vsel %vm2888_vm13, %v2779_v3, 0.0  ;;  %vm2935_vm13 = vcmp.le.s32.totalorder %v32_v24, 14 }
  0x13   :  { %v61_v55 = vsel %vm2898_vm14, %v2770_v1, 0.0  ;;  %vm413_vm14 = vmand %vm44_vm11, %vm2935_vm13 }
  0x14   :  { %420 = vrot.lane.b32.xlu0 %v2779_v3, %s2723_s25 }
  0x16   :  { %604 = vrot.lane.b32.xlu1 %v2770_v1, %s2724_s26 }
  0x18   :  { %602 = vrot.lane.b32.xlu0 %v2775_v2, %s2724_s26 }
  0x1a   :  { %606 = vrot.lane.b32.xlu1 %v2779_v3, %s2724_s26 }
  0x1c   :  { %600 = vrot.lane.b32.xlu0 %v2765_v0, %s2724_s26 }
  0x1e   :  { %790 = vrot.lane.b32.xlu1 %v2775_v2, %s2725_s0 }
  0x20   :  { %608 = vrot.lane.b32.xlu0 %v23_v5, %s2724_s26 }
  0x22   :  { %788 = vrot.lane.b32.xlu1 %v2765_v0, %s2725_s0 }
  0x24   :  { %792 = vrot.lane.b32.xlu0 %v2770_v1, %s2725_s0 }
  0x26   :  { %796 = vrot.lane.b32.xlu1 %v23_v5, %s2725_s0 }
  0x28   :  { %794 = vrot.lane.b32.xlu0 %v2779_v3, %s2725_s0 }
  0x2a   :  { %964 = vrot.lane.b32.xlu1 %v2770_v1, %s2726_s27 }
  0x2c   :  { %962 = vrot.lane.b32.xlu0 %v2775_v2, %s2726_s27 }
  0x2e   :  { %966 = vrot.lane.b32.xlu1 %v2779_v3, %s2726_s27 }
  0x30   :  { %960 = vrot.lane.b32.xlu0 %v2765_v0, %s2726_s27 }
  0x32   :  { %1156 = vrot.lane.b32.xlu1 %v2775_v2, %s2727_s28 }
  0x34   :  { %968 = vrot.lane.b32.xlu0 %v23_v5, %s2726_s27 }
  0x36   :  { %1154 = vrot.lane.b32.xlu1 %v2765_v0, %s2727_s28 }
  0x38   :  { %1158 = vrot.lane.b32.xlu0 %v2770_v1, %s2727_s28 }
  0x3a   :  { %1162 = vrot.lane.b32.xlu1 %v23_v5, %s2727_s28 }
  0x3c   :  { %1160 = vrot.lane.b32.xlu0 %v2779_v3, %s2727_s28 }
  0x3e   :  { %1344 = vrot.lane.b32.xlu1 %v2770_v1, %s2728_s29 }
  0x40   :  { %1342 = vrot.lane.b32.xlu0 %v2775_v2, %s2728_s29 }
  0x42   :  { %1346 = vrot.lane.b32.xlu1 %v2779_v3, %s2728_s29 }
  0x44   :  { %1340 = vrot.lane.b32.xlu0 %v2765_v0, %s2728_s29 }
  0x46   :  { %1532 = vrot.lane.b32.xlu1 %v2775_v2, %s2729_s30 }
  0x48   :  { %1348 = vrot.lane.b32.xlu0 %v23_v5, %s2728_s29 }
  0x4a   :  { %1530 = vrot.lane.b32.xlu1 %v2765_v0, %s2729_s30  ;;  %v1740_v0 = vld [vmem:[%s3451_s3 + $0x8] sm:$0xff] }
  0x4c   :  { %1534 = vrot.lane.b32.xlu0 %v2770_v1, %s2729_s30 }
  0x4e   :  { %1538 = vrot.lane.b32.xlu1 %v23_v5, %s2729_s30 }
  0x50   :  { %1536 = vrot.lane.b32.xlu0 %v2779_v3, %s2729_s30 }
  0x54   :  { %1719 = vperm.xlu0 %2694, %v1716_v7  }
  0x74   :  { %v66_v17 = vpop.permute.xlu1 %65 }
  0x76   :  { %v68_v22 = vpop.permute.xlu0 %67 }
  0x77   :  { %v76_v31 = vsel %vm75_vm1, %v66_v17, %v68_v22 }
  0x78   :  { %v72_v27 = vpop.permute.xlu1 %71  ;;  %v84_v41 = vsel %vm41_vm4, %v76_v31, 0.0 }
  0x7a   :  { %v70_v32 = vpop.permute.xlu0 %69 }
  0x7b   :  { %v77_v35 = vsel %vm75_vm1, %v68_v22, %v70_v32  ;;  %v78_v44 = vsel %vm75_vm1, %v70_v32, %v72_v27 }
  0x7c   :  { %v417_v37 = vpop.permute.xlu1 %416  ;;  %v85_v38 = vsel %vm42_vm3, %v77_v35, 0.0  ;;  %v86_v53 = vsel %vm43_vm12, %v78_v44, 0.0 }
  0x7d   :  { %2469 = vmatprep.subr.msk.mxu0 %vm94_vm6, %v85_v38 }
  0x7e   :  { %2470 = vmatpush1.msk.msra.mxu0 %vm94_vm6, %v84_v41  ;;  %v74_v45 = vpop.permute.xlu0 %73  ;;  %v2495_v41 = vld [vmem:[%s3449_s1 + $0x20] sm:$0xff] }
  0x7f   :  { %2471 = vmatmul.mubr.msk.f32.vlgmr.msra.gmra.mrb[0].mxu0 %vm90_vm10, %v2468_v39  ;;  %v79_v48 = vsel %vm75_vm1, %v72_v27, %v74_v45  ;;  %2475 = vmatprep.subr.msk.mxu0 %vm94_vm6, %v60_v40  ;;  %vm2927_vm1 = vmand %vm42_vm3, %vm2902_vm15  ;;  %v2488_v27 = vld [vmem:[%s3449_s1 + $0x18] sm:$0xff] }
  0x80   :  { %v415_v49 = vpop.permute.xlu1 %414  ;;  %v87_v50 = vsel %vm44_vm11, %v79_v48, 0.0  ;;  %2476 = vmatpush1.msk.msra.mxu0 %vm94_vm6, %v59_v42  ;;  %328 = vmatprep.mubr.f32.mxu0 %v2722_v4  ;;  %vm2946_vm3 = vmand %vm41_vm4, %vm2916_vm5  ;;  %vm2959_vm4 = vcmp.le.s32.totalorder %v31_v26, 14  ;;  %vm610_vm11 = vcmask 916480  }
  0x81   :  { %2472 = vmatprep.subr.msk.mxu1 %vm94_vm6, %v87_v50  ;;  %v425_v60 = vsel %vm424_vm7, %v415_v49, %v417_v37 }
  0x82   :  { %2473 = vmatpush1.msk.msra.mxu1 %vm94_vm6, %v86_v53  ;;  %v419_v56 = vpop.permute.xlu0 %418  ;;  %v433_v2 = vsel %vm2946_vm3, %v425_v60, 0.0  ;;  %vm1147_vm3 = vcmp.le.s32.totalorder %v2822_v18, 14  ;;  %v1744_v60 = vld [vmem:[%s3451_s3 + $0x28] sm:$0xff] }
  0x83   :  { %v426_v58 = vsel %vm424_vm7, %v417_v37, %v419_v56  ;;  %2474 = vmatmul.mubr.msk.f32.vlgmr.msra.gmra.mrb[0].mxu1 %vm90_vm10, %v2468_v39  ;;  %2478 = vmatprep.subr.msk.mxu1 %vm94_vm6, %v62_v51  ;;  %v2502_v51 = vld [vmem:[%s3449_s1 + $0x28] sm:$0xff] }
  0x84   :  { %v434_v61 = vsel %vm2927_vm1, %v426_v58, 0.0  ;;  %v423_v62 = vpop.permute.xlu1 %422  ;;  %2479 = vmatpush1.msk.msra.mxu1 %vm94_vm6, %v61_v55  ;;  %399 = vmatprep.mubr.f32.mxu1 %v2722_v4  ;;  %vm412_vm1 = vmand %vm43_vm12, %vm2959_vm4  ;;  %vm798_vm12 = vcmask 908288  }
  0x85   :  { %2482 = vmatprep.subr.msk.mxu0 %vm94_vm6, %v434_v61  ;;  %v1746_v61 = vld [vmem:[%s3451_s3 + $0x38] sm:$0xff] }
  0x86   :  { %v421_v1 = vpop.permute.xlu0 %420 }
  0x87   :  { %v428_v3 = vsel %vm424_vm7, %v421_v1, %v423_v62  ;;  %2477 = vmatmul.mubr.msk.f32.vlgmr.msra.gmra.mrb[0].mxu0 %vm90_vm10, %v63_v63  ;;  %v427_v5 = vsel %vm424_vm7, %v419_v56, %v421_v1  ;;  %vm970_vm7 = vcmask 900096  }
  0x88   :  { %v436_v6 = vsel %vm413_vm14, %v428_v3, 0.0  ;;  %2483 = vmatpush1.msk.msra.mxu0 %vm94_vm6, %v433_v2  ;;  %v605_v7 = vpop.permute.xlu1 %604  ;;  %518 = vmatprep.mubr.f32.mxu0 %v2722_v4  ;;  %v435_v9 = vsel %vm412_vm1, %v427_v5, 0.0  ;;  %vm1146_vm14 = vcmp.le.s32.totalorder %v2824_v20, 14  ;;  %vm1164_vm1 = vcmask 785408   ;;  %v2509_v3 = vld [vmem:[%s3449_s1 + $0x30] sm:$0xff]  ;;  %v2541_v2 = vld [vmem:[%s3451_s3 + $0x98] sm:$0xff] }
  0x89   :  { %2485 = vmatprep.subr.msk.mxu1 %vm94_vm6, %v436_v6 }
  0x8a   :  { %v603_v8 = vpop.permute.xlu0 %602 }
  0x8b   :  { %v612_v10 = vsel %vm610_vm11, %v603_v8, %v605_v7  ;;  %2480 = vmatmul.mubr.msk.f32.vlgmr.msra.gmra.mrb[0].mxu1 %vm90_vm10, %v63_v63 }
  0x8c   :  { %v620_v11 = vsel %vm2827_vm0, %v612_v10, 0.0  ;;  %2486 = vmatpush1.msk.msra.mxu1 %vm94_vm6, %v435_v9  ;;  %v607_v12 = vpop.permute.xlu1 %606  ;;  %589 = vmatprep.mubr.f32.mxu1 %v2722_v4 }
  0x8d   :  { %2489 = vmatprep.subr.msk.mxu0 %vm94_vm6, %v620_v11  ;;  %v613_v19 = vsel %vm610_vm11, %v605_v7, %v607_v12 }
  0x8e   :  { %v601_v14 = vpop.permute.xlu0 %600  ;;  %v621_v30 = vsel %vm2864_vm9, %v613_v19, 0.0 }
  0x8f   :  { %v611_v15 = vsel %vm610_vm11, %v601_v14, %v603_v8  ;;  %2484 = vmatmul.mubr.msk.f32.vlgmr.msra.gmra.mrb[0].mxu0 %vm90_vm10, %v2481_v13 }
  0x90   :  { %v619_v16 = vsel %vm2831_vm2, %v611_v15, 0.0  ;;  %v791_v17 = vpop.permute.xlu1 %790  ;;  %704 = vmatprep.mubr.f32.mxu0 %v2722_v4 }
  0x91   :  { %2490 = vmatpush1.msk.msra.mxu0 %vm94_vm6, %v619_v16  ;;  %v2516_v16 = vld [vmem:[%s3449_s1 + $0x38] sm:$0xff] }
  0x92   :  { %v609_v21 = vpop.permute.xlu0 %608 }
  0x93   :  { %v614_v22 = vsel %vm610_vm11, %v607_v12, %v609_v21  ;;  %2487 = vmatmul.mubr.msk.f32.vlgmr.msra.gmra.mrb[0].mxu1 %vm90_vm10, %v2481_v13  ;;  %vm3049_vm11 = vmand %vm1147_vm3, %vm2827_vm0  ;;  %vm1149_vm0 = vcmp.le.s32.totalorder %v2837_v28, 14 }
  0x94   :  { %v622_v24 = vsel %vm2859_vm8, %v614_v22, 0.0  ;;  %v789_v26 = vpop.permute.xlu1 %788  ;;  %775 = vmatprep.mubr.f32.mxu1 %v2722_v4 }
  0x95   :  { %2492 = vmatprep.subr.msk.mxu1 %vm94_vm6, %v622_v24  ;;  %v799_v33 = vsel %vm798_vm12, %v789_v26, %v791_v17 }
  0x96   :  { %2493 = vmatpush1.msk.msra.mxu1 %vm94_vm6, %v621_v30  ;;  %v793_v31 = vpop.permute.xlu0 %792  ;;  %v2531_v30 = vld [vmem:[%s3451_s3 + $0x48] sm:$0xff] }
  0x97   :  { %v800_v32 = vsel %vm798_vm12, %v791_v17, %v793_v31  ;;  %2491 = vmatmul.mubr.msk.f32.vlgmr.msra.gmra.mrb[0].mxu0 %vm90_vm10, %v2488_v27 }
  0x98   :  { %v797_v35 = vpop.permute.xlu1 %796  ;;  %2496 = vmatprep.subr.msk.mxu0 %vm94_vm6, %v800_v32  ;;  %878 = vmatprep.mubr.f32.mxu0 %v2722_v4 }
  0x99   :  { %2497 = vmatpush1.msk.msra.mxu0 %vm94_vm6, %v799_v33 }
  0x9a   :  { %v795_v37 = vpop.permute.xlu0 %794 }
  0x9b   :  { %v801_v38 = vsel %vm798_vm12, %v793_v31, %v795_v37  ;;  %v802_v39 = vsel %vm798_vm12, %v795_v37, %v797_v35  ;;  %2494 = vmatmul.mubr.msk.f32.vlgmr.msra.gmra.mrb[0].mxu1 %vm90_vm10, %v2488_v27  ;;  %vm1148_vm12 = vcmp.le.s32.totalorder %v2840_v29, 14  ;;  %v2533_v31 = vld [vmem:[%s3451_s3 + $0x58] sm:$0xff] }
  0x9c   :  { %v965_v40 = vpop.permute.xlu1 %964  ;;  %2499 = vmatprep.subr.msk.mxu1 %vm94_vm6, %v802_v39  ;;  %949 = vmatprep.mubr.f32.mxu1 %v2722_v4  ;;  %v2587_v20 = vpack.c.bf16 %v2533_v31, %v2531_v30  ;;  %v1742_v29 = vld [vmem:[%s3451_s3 + $0x18] sm:$0xff] }
  0x9d   :  { %2500 = vmatpush1.msk.msra.mxu1 %vm94_vm6, %v801_v38  ;;  %v2595_v28 = vpack.c.bf16 %v1742_v29, %v1740_v0 }
  0x9e   :  { %v963_v42 = vpop.permute.xlu0 %962 }
  0x9f   :  { %v972_v43 = vsel %vm970_vm7, %v963_v42, %v965_v40  ;;  %2498 = vmatmul.mubr.msk.f32.vlgmr.msra.gmra.mrb[0].mxu0 %vm90_vm10, %v2495_v41 }
  0xa0   :  { %v980_v44 = vsel %vm2902_vm15, %v972_v43, 0.0  ;;  %v967_v45 = vpop.permute.xlu1 %966  ;;  %1064 = vmatprep.mubr.f32.mxu0 %v2722_v4  ;;  %v2532_v43 = vld [vmem:[%s3451_s3 + $0x50] sm:$0xff] }
  0xa1   :  { %2503 = vmatprep.subr.msk.mxu0 %vm94_vm6, %v980_v44  ;;  %v973_v53 = vsel %vm970_vm7, %v965_v40, %v967_v45  ;;  %v2523_v40 = vld [vmem:[%s3449_s1 + $0x40] sm:$0xff] }
  0xa2   :  { %v961_v46 = vpop.permute.xlu0 %960  ;;  %v981_v59 = vsel %vm2959_vm4, %v973_v53, 0.0  ;;  %v2535_v53 = vld [vmem:[%s3451_s3 + $0x68] sm:$0xff] }
  0xa3   :  { %v971_v48 = vsel %vm970_vm7, %v961_v46, %v963_v42  ;;  %2501 = vmatmul.mubr.msk.f32.vlgmr.msra.gmra.mrb[0].mxu1 %vm90_vm10, %v2495_v41 }
  0xa4   :  { %v979_v49 = vsel %vm2916_vm5, %v971_v48, 0.0  ;;  %v1157_v50 = vpop.permute.xlu1 %1156  ;;  %1135 = vmatprep.mubr.f32.mxu1 %v2722_v4 }
  0xa5   :  { %2504 = vmatpush1.msk.msra.mxu0 %vm94_vm6, %v979_v49  ;;  %v1739_v49 = vld [vmem:[%s3451_s3] sm:$0xff] }
  0xa6   :  { %v969_v54 = vpop.permute.xlu0 %968 }
  0xa7   :  { %v974_v55 = vsel %vm970_vm7, %v967_v45, %v969_v54  ;;  %2505 = vmatmul.mubr.msk.f32.vlgmr.msra.gmra.mrb[0].mxu0 %vm90_vm10, %v2502_v51  ;;  %vm3058_vm7 = vmand %vm1146_vm14, %vm2831_vm2  ;;  %v2537_v54 = vld [vmem:[%s3451_s3 + $0x78] sm:$0xff] }
  0xa8   :  { %v982_v56 = vsel %vm2935_vm13, %v974_v55, 0.0  ;;  %v1155_v58 = vpop.permute.xlu1 %1154  ;;  %1258 = vmatprep.mubr.f32.mxu0 %v2722_v4  ;;  %vm3073_vm2 = vmand %vm1148_vm12, %vm2864_vm9  ;;  %vm1350_vm9 = vcmask 777216   ;;  %v2591_v55 = vpack.c.bf16 %v2537_v54, %v2535_v53 }
  0xa9   :  { %2506 = vmatprep.subr.msk.mxu1 %vm94_vm6, %v982_v56  ;;  %v1165_v62 = vsel %vm1164_vm1, %v1155_v58, %v1157_v50  ;;  %v2534_v56 = vld [vmem:[%s3451_s3 + $0x60] sm:$0xff]  ;;  %v2536_v58 = vld [vmem:[%s3451_s3 + $0x70] sm:$0xff] }
  0xaa   :  { %2507 = vmatpush1.msk.msra.mxu1 %vm94_vm6, %v981_v59  ;;  %v1159_v23 = vpop.permute.xlu0 %1158  ;;  %v1173_v5 = vsel %vm3058_vm7, %v1165_v62, 0.0  ;;  %vm3137_vm7 = vmand %vm1146_vm14, %vm2916_vm5  ;;  %v2593_v59 = vpack.c.bf16 %v2536_v58, %v2534_v56  ;;  %v2599_v62 = vpack.c.bf16 %v1746_v61, %v1744_v60 }
  0xab   :  { %v1166_v63 = vsel %vm1164_vm1, %v1157_v50, %v1159_v23  ;;  %2508 = vmatmul.mubr.msk.f32.vlgmr.msra.gmra.mrb[0].mxu1 %vm90_vm10, %v2502_v51  ;;  %vm1529_vm5 = vmand %vm1149_vm0, %vm2935_vm13  ;;  %v1741_v50 = vld [vmem:[%s3451_s3 + $0x10] sm:$0xff] }
  0xac   :  { %v1174_v25 = vsel %vm3049_vm11, %v1166_v63, 0.0  ;;  %v1163_v1 = vpop.permute.xlu1 %1162  ;;  %1329 = vmatprep.mubr.f32.mxu1 %v2722_v4  ;;  %vm1153_vm11 = vmand %vm1149_vm0, %vm2859_vm8  ;;  %vm1540_vm8 = vcmask 769024   ;;  %v2597_v51 = vpack.c.bf16 %v1741_v50, %v1739_v49  ;;  %v1745_v63 = vld [vmem:[%s3451_s3 + $0x30] sm:$0xff] }
  0xad   :  { %2510 = vmatprep.subr.msk.mxu0 %vm94_vm6, %v1174_v25 }
  0xae   :  { %v1161_v36 = vpop.permute.xlu0 %1160  ;;  %2511 = vmatpush1.msk.msra.mxu0 %vm94_vm6, %v1173_v5  ;;  %v2547_v5 = vld [vmem:[%s3451_s3 + $0xc8] sm:$0xff] }
  0xaf   :  { %v1167_v6 = vsel %vm1164_vm1, %v1159_v23, %v1161_v36  ;;  %v1168_v7 = vsel %vm1164_vm1, %v1161_v36, %v1163_v1  ;;  %2512 = vmatmul.mubr.msk.f32.vlgmr.msra.gmra.mrb[0].mxu0 %vm90_vm10, %v2509_v3  ;;  %vm3129_vm1 = vmand %vm1147_vm3, %vm2902_vm15  ;;  %v1743_v23 = vld [vmem:[%s3451_s3 + $0x20] sm:$0xff]  ;;  %v2539_v1 = vld [vmem:[%s3451_s3 + $0x88] sm:$0xff] }
  0xb0   :  { %v1175_v8 = vsel %vm3073_vm2, %v1167_v6, 0.0  ;;  %v1176_v9 = vsel %vm1153_vm11, %v1168_v7, 0.0  ;;  %v1345_v10 = vpop.permute.xlu1 %1344  ;;  %1444 = vmatprep.mubr.f32.mxu0 %v2722_v4  ;;  %vm3149_vm15 = vmand %vm1148_vm12, %vm2959_vm4  ;;  %v2601_v25 = vpack.c.bf16 %v1745_v63, %v1743_v23  ;;  %v2549_v36 = vld [vmem:[%s3451_s3 + $0xd8] sm:$0xff] }
  0xb1   :  { %2513 = vmatprep.subr.msk.mxu1 %vm94_vm6, %v1176_v9  ;;  %v2611_v6 = vpack.c.bf16 %v2549_v36, %v2547_v5  ;;  %v2540_v9 = vld [vmem:[%s3451_s3 + $0x90] sm:$0xff] }
  0xb2   :  { %2514 = vmatpush1.msk.msra.mxu1 %vm94_vm6, %v1175_v8  ;;  %v1343_v34 = vpop.permute.xlu0 %1342  ;;  %v2538_v8 = vld [vmem:[%s3451_s3 + $0x80] sm:$0xff] }
  0xb3   :  { %v1352_v11 = vsel %vm1350_vm9, %v1343_v34, %v1345_v10  ;;  %2515 = vmatmul.mubr.msk.f32.vlgmr.msra.gmra.mrb[0].mxu1 %vm90_vm10, %v2509_v3  ;;  %v2603_v3 = vpack.c.bf16 %v2541_v2, %v2539_v1  ;;  %v2544_v1 = vld [vmem:[%s3451_s3 + $0xb0] sm:$0xff] }
  0xb4   :  { %v1360_v12 = vsel %vm1147_vm3, %v1352_v11, 0.0  ;;  %v1347_v13 = vpop.permute.xlu1 %1346  ;;  %1515 = vmatprep.mubr.f32.mxu1 %v2722_v4  ;;  %v3243_v11 = vld [vmem:[%s3451_s3 + $0xd0] sm:$0xff] }
  0xb5   :  { %2517 = vmatprep.subr.msk.mxu0 %vm94_vm6, %v1360_v12  ;;  %v1353_v21 = vsel %vm1350_vm9, %v1345_v10, %v1347_v13  ;;  %v3248_v12 = vld [vmem:[%s3451_s3 + $0xa8] sm:$0xff] }
  0xb6   :  { %v1341_v14 = vpop.permute.xlu0 %1340  ;;  %v1361_v32 = vsel %vm1148_vm12, %v1353_v21, 0.0 }
  0xb7   :  { %v1351_v15 = vsel %vm1350_vm9, %v1341_v14, %v1343_v34  ;;  %v3238_v34 = vld [vmem:[%s3451_s3 + $0xc0] sm:$0xff] }
  0xb8   :  { %v1359_v17 = vsel %vm1146_vm14, %v1351_v15, 0.0  ;;  %v1533_v19 = vpop.permute.xlu1 %1532  ;;  %v3253_v15 = vld [vmem:[%s3451_s3 + $0xb8] sm:$0xff] }
  0xb9   :  { %2518 = vmatpush1.msk.msra.mxu0 %vm94_vm6, %v1359_v17  ;;  %v3263_v17 = vld [vmem:[%s3451_s3 + $0xf8] sm:$0xff]  ;;  %v2607_v30 = vpack.c.bf16 %v3253_v15, %v3248_v12 }
  0xba   :  { %v1349_v22 = vpop.permute.xlu0 %1348  ;;  %2519 = vmatmul.mubr.msk.f32.vlgmr.msra.gmra.mrb[0].mxu0 %vm90_vm10, %v2516_v16 }
  0xbb   :  { %v1354_v24 = vsel %vm1350_vm9, %v1347_v13, %v1349_v22  ;;  %1634 = vmatprep.mubr.f32.mxu0 %v2722_v4  ;;  %v2605_v22 = vpack.c.bf16 %v2540_v9, %v2538_v8 }
  0xbc   :  { %v1362_v26 = vsel %vm1149_vm0, %v1354_v24, 0.0  ;;  %v1531_v27 = vpop.permute.xlu1 %1530 }
  0xbd   :  { %2520 = vmatprep.subr.msk.mxu1 %vm94_vm6, %v1362_v26  ;;  %v1541_v37 = vsel %vm1540_vm8, %v1531_v27, %v1533_v19  ;;  %v2613_v27 = vpack.c.bf16 %v3243_v11, %v3238_v34  ;;  %v2550_v34 = vld [vmem:[%s3451_s3 + $0xe0] sm:$0xff]  ;;  %v2552_v11 = vld [vmem:[%s3451_s3 + $0xf0] sm:$0xff] }
  0xbe   :  { %2521 = vmatpush1.msk.msra.mxu1 %vm94_vm6, %v1361_v32  ;;  %v1535_v38 = vpop.permute.xlu0 %1534  ;;  %v1549_v41 = vsel %vm3137_vm7, %v1541_v37, 0.0 }
  0xbf   :  { %v1542_v47 = vsel %vm1540_vm8, %v1533_v19, %v1535_v38  ;;  %2522 = vmatmul.mubr.msk.f32.vlgmr.msra.gmra.mrb[0].mxu1 %vm90_vm10, %v2516_v16  ;;  %v3258_v16 = vld [vmem:[%s3451_s3 + $0xe8] sm:$0xff] }
  0xc0   :  { %v1550_v52 = vsel %vm3129_vm1, %v1542_v47, 0.0  ;;  %v1539_v39 = vpop.permute.xlu1 %1538  ;;  %1705 = vmatprep.mubr.f32.mxu1 %v2722_v4  ;;  %v2530_v4 = vld [vmem:[%s3451_s3 + $0x40] sm:$0xff]  ;;  %v2615_v31 = vpack.c.bf16 %v3263_v17, %v3258_v16  ;;  %v2563_v17 = vld [vmem:[%s3451_s3 + $0x148] sm:$0xff] }
  0xc1   :  { %2524 = vmatprep.subr.msk.mxu0 %vm94_vm6, %v1550_v52  ;;  %v2589_v48 = vpack.c.bf16 %v2532_v43, %v2530_v4 }
  0xc2   :  { %v1537_v42 = vpop.permute.xlu0 %1536  ;;  %2525 = vmatpush1.msk.msra.mxu0 %vm94_vm6, %v1549_v41 }
  0xc3   :  { %v1543_v44 = vsel %vm1540_vm8, %v1535_v38, %v1537_v42  ;;  %v1544_v45 = vsel %vm1540_vm8, %v1537_v42, %v1539_v39  ;;  %2526 = vmatmul.mubr.msk.f32.vlgmr.msra.gmra.mrb[0].mxu0 %vm90_vm10, %v2523_v40  ;;  %2588 = vmatprep.subr.bf16.mxu0 %v2587_v20 }
  0xc4   :  { %v1551_v57 = vsel %vm3149_vm15, %v1543_v44, 0.0  ;;  %v1552_v46 = vsel %vm1529_vm5, %v1544_v45, 0.0 }
  0xc5   :  { %2527 = vmatprep.subr.msk.mxu1 %vm94_vm6, %v1552_v46 }
  0xc6   :  { %2528 = vmatpush1.msk.msra.mxu1 %vm94_vm6, %v1551_v57  ;;  %vm1736_vm6 = vcmask 1040384  }
  0xc7   :  { %2529 = vmatmul.mubr.msk.f32.vlgmr.msra.gmra.mrb[0].mxu1 %vm90_vm10, %v2523_v40  ;;  %2596 = vmatprep.subr.bf16.mxu1 %v2595_v28  ;;  %vm2452_vm10 = vcmask 254976  }
  0xc9   :  { %2590 = vmatpush1.bf16.xpose.msra.mxu0 %v2589_v48 }
  0xca   :  { %2592 = vmatprep.subr.bf16.mxu0 %v2591_v55 }
  0xcd   :  { %2598 = vmatpush1.bf16.xpose.msra.mxu1 %v2597_v51 }
  0xce   :  { %2600 = vmatprep.subr.bf16.mxu1 %v2599_v62 }
  0xd1   :  { %2594 = vmatpush1.bf16.xpose.msra.mxu0 %v2593_v59 }
  0xd2   :  { %2604 = vmatprep.subr.bf16.mxu0 %v2603_v3 }
  0xd3   :  { %v1720_v7 = vpop.permute.xlu0 %1719 }
  0xd5   :  { %2602 = vmatpush1.bf16.xpose.msra.mxu1 %v2601_v25  ;;  %v2542_v25 = vld [vmem:[%s3451_s3 + $0xa0] sm:$0xff] }
  0xd6   :  { %2612 = vmatprep.subr.bf16.mxu1 %v2611_v6  ;;  %v2555_v6 = vld [vmem:[%s3451_s3 + $0x108] sm:$0xff]  ;;  %v2609_v16 = vpack.c.bf16 %v2544_v1, %v2542_v25 }
 0x196   :  { %v1636_v10 = vpop.f32.mrb[0].mxu0 }
 0x197   :  { %v1722_v13 = vadd.f32 %v1720_v7, %v1636_v10  ;;  %v1638_v14 = vpop.f32.mrb[1].mxu0 }
 0x198   :  { %v1723_v19 = vadd.f32 %v1720_v7, %v1638_v14 }
 0x199   :  { %v3265_v21 = vmax.f32 %v1722_v13, 0.0 }
 0x19a   :  { %v3267_v24 = vmax.f32 %v1723_v19, 0.0  ;;  %v1707_v26 = vpop.f32.mrb[0].mxu1  ;;  %v2565_v19 = vld [vmem:[%s3451_s3 + $0x158] sm:$0xff] }
 0x19b   :  { %v1724_v32 = vadd.f32 %v1720_v7, %v1707_v26  ;;  %v1709_v33 = vpop.f32.mrb[1].mxu1  ;;  %v1749_v35 = vrot.slane %v3265_v21, 1  ;;  %v1904_v37 = vrot.slane %v3265_v21, 2  ;;  %v1994_v38 = vrot.slane %v3265_v21, 3 }
 0x19c   :  { %v1725_v47 = vadd.f32 %v1720_v7, %v1709_v33  ;;  %v1750_v18 = vrot.slane %v3267_v24, 1  ;;  %v1905_v20 = vrot.slane %v3267_v24, 2  ;;  %v1995_v52 = vrot.slane %v3267_v24, 3  ;;  %v2557_v7 = vld [vmem:[%s3451_s3 + $0x118] sm:$0xff]  ;;  %v2562_v33 = vld [vmem:[%s3451_s3 + $0x140] sm:$0xff] }
 0x19d   :  { %v1728_v39 = vmax.f32 %v1724_v32, 0.0  ;;  %v2085_v40 = vrot.slane %v3267_v24, 4  ;;  %v2175_v0 = vrot.slane %v3267_v24, 5  ;;  %v2084_v29 = vrot.slane %v3265_v21, 4  ;;  %v2561_v32 = vld [vmem:[%s3451_s3 + $0x138] sm:$0xff] }
 0x19e   :  { %v1729_v41 = vmax.f32 %v1725_v47, 0.0  ;;  %v2265_v42 = vrot.slane %v3267_v24, 6  ;;  %v2174_v4 = vrot.slane %v3265_v21, 5  ;;  %v2355_v43 = vrot.slane %v3267_v24, 7  ;;  %v2569_v47 = vld [vmem:[%s3451_s3 + $0x178] sm:$0xff] }
 0x19f   :  { %v1753_v44 = vsel %vm1736_vm6, %v1749_v35, %v1728_v39  ;;  %v1732_v45 = vrot.slane %v1728_v39, 7  ;;  %v1908_v28 = vrot.slane %v1728_v39, 1  ;;  %v1998_v57 = vrot.slane %v1728_v39, 2  ;;  %v2564_v35 = vld [vmem:[%s3451_s3 + $0x150] sm:$0xff] }
 0x1a0   :  { %v1754_v46 = vsel %vm1736_vm6, %v1750_v18, %v1729_v41  ;;  %v1733_v48 = vrot.slane %v1729_v41, 7  ;;  %v1909_v49 = vrot.slane %v1729_v41, 1  ;;  %v1999_v50 = vrot.slane %v1729_v41, 2 }
 0x1a1   :  { %1828 = vmatprep.mubr.f32.mxu0 %v1754_v46  ;;  %v1737_v51 = vsel %vm1736_vm6, %v3265_v21, %v1732_v45  ;;  %v1912_v53 = vsel %vm1736_vm6, %v1904_v37, %v1908_v28  ;;  %v2089_v54 = vrot.slane %v1729_v41, 3  ;;  %v2002_v55 = vsel %vm1736_vm6, %v1994_v38, %v1998_v57  ;;  %v2567_v38 = vld [vmem:[%s3451_s3 + $0x168] sm:$0xff]  ;;  %v2570_v46 = vld [vmem:[%s3451_s3 + $0x180] sm:$0xff] }
 0x1a2   :  { %1829 = vmatmul.mubr.f32.vlgmr.msra.gmra.mrb[2].mxu0 %v1753_v44  ;;  %v1738_v56 = vsel %vm1736_vm6, %v3267_v24, %v1733_v48  ;;  %v1913_v58 = vsel %vm1736_vm6, %v1905_v20, %v1909_v49  ;;  %v2003_v59 = vsel %vm1736_vm6, %v1995_v52, %v1999_v50  ;;  %v2179_v60 = vrot.slane %v1729_v41, 4  ;;  %v2581_v44 = vld [vmem:[%s3451_s3 + $0x1d8] sm:$0xff]  ;;  %v2572_v48 = vld [vmem:[%s3451_s3 + $0x190] sm:$0xff]  ;;  %v2575_v49 = vld [vmem:[%s3451_s3 + $0x1a8] sm:$0xff] }
 0x1a3   :  { %2606 = vmatpush1.bf16.xpose.msra.mxu0 %v2605_v22  ;;  %1898 = vmatprep.mubr.f32.mxu1 %v1738_v56  ;;  %v2093_v61 = vsel %vm1736_vm6, %v2085_v40, %v2089_v54  ;;  %v2088_v62 = vrot.slane %v1728_v39, 3  ;;  %v2269_v23 = vrot.slane %v1729_v41, 5  ;;  %v2178_v63 = vrot.slane %v1728_v39, 4  ;;  %v2560_v40 = vld [vmem:[%s3451_s3 + $0x130] sm:$0xff]  ;;  %v2577_v50 = vld [vmem:[%s3451_s3 + $0x1b8] sm:$0xff] }
 0x1a4   :  { %1987 = vmatprep.mubr.f32.mxu0 %v1913_v58  ;;  %1899 = vmatmul.mubr.f32.vlgmr.msra.gmra.mrb[2].mxu1 %v1737_v51  ;;  %v2183_v2 = vsel %vm1736_vm6, %v2175_v0, %v2179_v60  ;;  %v2359_v3 = vrot.slane %v1729_v41, 6  ;;  %v2264_v5 = vrot.slane %v3265_v21, 6  ;;  %v2268_v36 = vrot.slane %v1728_v39, 5  ;;  %v2571_v0 = vld [vmem:[%s3451_s3 + $0x188] sm:$0xff]  ;;  %v2566_v41 = vld [vmem:[%s3451_s3 + $0x160] sm:$0xff]  ;;  %v2585_v56 = vld [vmem:[%s3451_s3 + $0x1f8] sm:$0xff] }
 0x1a5   :  { %2614 = vmatpush1.bf16.xpose.msra.mxu1 %v2613_v27  ;;  %2077 = vmatprep.mubr.f32.mxu1 %v2003_v59  ;;  %v3313_v8 = vsel %vm1736_vm6, %v2084_v29, %v2088_v62  ;;  %v3316_v9 = vsel %vm1736_vm6, %v2265_v42, %v2269_v23  ;;  %v3319_v10 = vsel %vm1736_vm6, %v2174_v4, %v2178_v63  ;;  %v2354_v14 = vrot.slane %v3265_v21, 7  ;;  %v2554_v21 = vld [vmem:[%s3451_s3 + $0x100] sm:$0xff]  ;;  %v2573_v29 = vld [vmem:[%s3451_s3 + $0x198] sm:$0xff]  ;;  %v2568_v42 = vld [vmem:[%s3451_s3 + $0x170] sm:$0xff] }
 0x1a6   :  { %2608 = vmatprep.subr.bf16.mxu0 %v2607_v30  ;;  %2616 = vmatprep.subr.bf16.mxu1 %v2615_v31  ;;  %v3328_v12 = vsel %vm1736_vm6, %v2355_v43, %v2359_v3  ;;  %v3331_v13 = vsel %vm1736_vm6, %v2264_v5, %v2268_v36  ;;  %v2358_v15 = vrot.slane %v1728_v39, 6  ;;  %v2619_v22 = vpack.c.bf16 %v2557_v7, %v2555_v6  ;;  %v2556_v30 = vld [vmem:[%s3451_s3 + $0x110] sm:$0xff]  ;;  %v2559_v31 = vld [vmem:[%s3451_s3 + $0x128] sm:$0xff]  ;;  %v2558_v39 = vld [vmem:[%s3451_s3 + $0x120] sm:$0xff] }
 0x1a7   :  { %v2617_v26 = vpack.c.bf16 %v2552_v11, %v2550_v34  ;;  %v2627_v27 = vpack.c.bf16 %v2565_v19, %v2563_v17  ;;  %v2621_v37 = vpack.c.bf16 %v2556_v30, %v2554_v21  ;;  %v2623_v18 = vpack.c.bf16 %v2561_v32, %v2559_v31  ;;  %v2579_v43 = vld [vmem:[%s3451_s3 + $0x1c8] sm:$0xff]  ;;  %v2578_v51 = vld [vmem:[%s3451_s3 + $0x1c0] sm:$0xff]  ;;  %v2576_v62 = vld [vmem:[%s3451_s3 + $0x1b0] sm:$0xff] }
 0x1a8   :  { %v3341_v24 = vsel %vm1736_vm6, %v2354_v14, %v2358_v15  ;;  %v2629_v20 = vpack.c.bf16 %v2564_v35, %v2562_v33  ;;  %v2631_v52 = vpack.c.bf16 %v2569_v47, %v2567_v38  ;;  %v2625_v4 = vpack.c.bf16 %v2560_v40, %v2558_v39  ;;  %v2582_v23 = vld [vmem:[%s3451_s3 + $0x1e0] sm:$0xff]  ;;  %v2584_v63 = vld [vmem:[%s3451_s3 + $0x1f0] sm:$0xff] }
 0x1a9   :  { %v2635_v45 = vpack.c.bf16 %v2573_v29, %v2571_v0  ;;  %v2633_v28 = vpack.c.bf16 %v2568_v42, %v2566_v41  ;;  %v2643_v57 = vpack.c.bf16 %v2581_v44, %v2579_v43  ;;  %v2637_v54 = vpack.c.bf16 %v2572_v48, %v2570_v46 }
 0x1aa   :  { %v2639_v58 = vpack.c.bf16 %v2577_v50, %v2575_v49  ;;  %v2649_v1 = vpack.c.bf16 %v2584_v63, %v2582_v23 }
 0x1ab   :  { %2610 = vmatpush1.bf16.xpose.msra.mxu0 %v2609_v16 }
 0x1ac   :  { %2620 = vmatprep.subr.bf16.mxu0 %v2619_v22 }
 0x1ad   :  { %2618 = vmatpush1.bf16.xpose.msra.mxu1 %v2617_v26 }
 0x1ae   :  { %2628 = vmatprep.subr.bf16.mxu1 %v2627_v27  ;;  %v2586_v27 = vld [vmem:[%s3452_s4] ss:$0 sm:$0xff] }
 0x1b2   :  { %1988 = vmatmul.mubr.f32.vlgmr.msra.gmra.mrb[4].mxu0 %v1912_v53  ;;  %v2580_v53 = vld [vmem:[%s3451_s3 + $0x1d0] sm:$0xff] }
 0x1b3   :  { %2622 = vmatpush1.bf16.xpose.msra.mxu0 %v2621_v37  ;;  %2167 = vmatprep.mubr.f32.mxu0 %v2093_v61  ;;  %v2645_v59 = vpack.c.bf16 %v2580_v53, %v2578_v51  ;;  %v2574_v61 = vld [vmem:[%s3451_s3 + $0x1a0] sm:$0xff] }
 0x1b4   :  { %2078 = vmatmul.mubr.f32.vlgmr.msra.gmra.mrb[4].mxu1 %v2002_v55  ;;  %2624 = vmatprep.subr.bf16.mxu0 %v2623_v18  ;;  %v2583_v55 = vld [vmem:[%s3451_s3 + $0x1e8] sm:$0xff]  ;;  %v2641_v25 = vpack.c.bf16 %v2576_v62, %v2574_v61 }
 0x1b5   :  { %2630 = vmatpush1.bf16.xpose.msra.mxu1 %v2629_v20  ;;  %2257 = vmatprep.mubr.f32.mxu1 %v2183_v2  ;;  %v2647_v60 = vpack.c.bf16 %v2585_v56, %v2583_v55 }
 0x1b6   :  { %2632 = vmatprep.subr.bf16.mxu1 %v2631_v52 }
 0x1bb   :  { %2626 = vmatpush1.bf16.xpose.msra.mxu0 %v2625_v4 }
 0x1bc   :  { %2636 = vmatprep.subr.bf16.mxu0 %v2635_v45 }
 0x1bd   :  { %2634 = vmatpush1.bf16.xpose.msra.mxu1 %v2633_v28 }
 0x1be   :  { %2644 = vmatprep.subr.bf16.mxu1 %v2643_v57 }
 0x1c2   :  { %2168 = vmatmul.mubr.f32.vlgmr.msra.gmra.mrb[6].mxu0 %v3313_v8 }
 0x1c3   :  { %2638 = vmatpush1.bf16.xpose.msra.mxu0 %v2637_v54  ;;  %2347 = vmatprep.mubr.f32.mxu0 %v3316_v9 }
 0x1c4   :  { %2258 = vmatmul.mubr.f32.vlgmr.msra.gmra.mrb[6].mxu1 %v3319_v10  ;;  %2640 = vmatprep.subr.bf16.mxu0 %v2639_v58 }
 0x1c5   :  { %2646 = vmatpush1.bf16.xpose.msra.mxu1 %v2645_v59  ;;  %2437 = vmatprep.mubr.f32.mxu1 %v3328_v12 }
 0x1c6   :  { %2648 = vmatprep.subr.bf16.mxu1 %v2647_v60 }
 0x1cb   :  { %2642 = vmatpush1.bf16.xpose.msra.mxu0 %v2641_v25 }
 0x1cd   :  { %2650 = vmatpush1.bf16.xpose.msra.mxu1 %v2649_v1 }
 0x1d2   :  { %2348 = vmatmul.mubr.f32.vlgmr.msra.gmra.mrb[8].mxu0 %v3331_v13 }
 0x1d4   :  { %2438 = vmatmul.mubr.f32.vlgmr.msra.gmra.mrb[8].mxu1 %v3341_v24 }
 0x275   :  { %v1830_v2 = vpop.f32.mrb[2].mxu0 }
 0x276   :  { %v1832_v3 = vpop.f32.mrb[3].mxu0 }
 0x277   :  { %v1900_v5 = vpop.f32.mrb[2].mxu1 }
 0x278   :  { %v1901_v36 = vadd.f32 %v1900_v5, %v1830_v2  ;;  %v1902_v6 = vpop.f32.mrb[3].mxu1 }
 0x285   :  { %v1989_v7 = vpop.f32.mrb[4].mxu0 }
 0x286   :  { %v1993_v8 = vadd.f32 %v1989_v7, %v1901_v36  ;;  %v1991_v9 = vpop.f32.mrb[5].mxu0 }
 0x287   :  { %v2079_v10 = vpop.f32.mrb[4].mxu1 }
 0x288   :  { %v2083_v34 = vadd.f32 %v2079_v10, %v1993_v8  ;;  %v2081_v11 = vpop.f32.mrb[5].mxu1 }
 0x295   :  { %v2169_v12 = vpop.f32.mrb[6].mxu0 }
 0x296   :  { %v2173_v14 = vadd.f32 %v2169_v12, %v2083_v34  ;;  %v2171_v15 = vpop.f32.mrb[7].mxu0 }
 0x297   :  { %v2259_v16 = vpop.f32.mrb[6].mxu1 }
 0x298   :  { %v2263_v17 = vadd.f32 %v2259_v16, %v2173_v14  ;;  %v2261_v19 = vpop.f32.mrb[7].mxu1 }
 0x2a5   :  { %v2349_v13 = vpop.f32.mrb[8].mxu0 }
 0x2a6   :  { %v2353_v22 = vadd.f32 %v2349_v13, %v2263_v17  ;;  %v2351_v24 = vpop.f32.mrb[9].mxu0 }
 0x2a7   :  { %v2439_v26 = vpop.f32.mrb[8].mxu1 }
 0x2a8   :  { %v2443_v21 = vadd.f32 %v2439_v26, %v2353_v22  ;;  %v2441_v30 = vpop.f32.mrb[9].mxu1 }
 0x2aa   :  { %v2451_v31 = vadd.f32 %v2586_v27, %v2443_v21 }
 0x2ac   :  { %2453 = vst.msk [vmem:[#allocation2] sm:$0x3] %vm2452_vm10, %v2451_v31 }
 0x2ad   :  { %2708 = shalt.err (!%p2705_p4)
}
 0x2ae   :  { %s2709_s19 = scalar_lea.hbm %s3453_s5, 32 }
 0x2af   :  { %p2710_p5 = scmp.ne.s32.totalorder %s3453_s5, %s2709_s19  ;;  %p2713_p6 = scmp.lt.u32.totalorder %s2709_s19, %s3453_s5 }
 0x2b1   :  { %p2715_p7 = pnand %p2713_p6, %p2710_p5 }
 0x2b3   :  { %2718 = shalt.err (!%p2715_p7)
}
 0x2b4   :  { %2463 = dma.vmem_to_hbm [thread:$0]  %s2461_s15, 32, %s3453_s5, [#allocation3]  }
 0x2b5   :  { %2719 = dma.done.wait [#allocation3], 32  }
 0x2b6   :  { %2720 = vsyncadd [#allocation3], 4294967264 }
 0x2b7   :  { %2467 = vsyncpa [#allocation3], 1 }

</bundles_post_ra>
